<compile_context>
chip_gen: v7x
topology: tpu7x:2x2x1
jax: 0.10.0
libtpu: 0.0.40
codegen_flags: <defaults>
</compile_context>

<pallas_src>
import math
import functools

import jax
import jax.numpy as jnp
from jax import lax
from jax.experimental import pallas as pl
from jax.experimental.pallas import tpu as pltpu


# ----------------------------------------------------------------------------
# Generic tiled matmul + bias:  O = A @ B + bias   (f32 MXU accumulation)
# ----------------------------------------------------------------------------
def _matmul_bias_kernel(a_ref, b_ref, bias_ref, o_ref, acc_ref):
    @pl.when(pl.program_id(2) == 0)
    def _init():
        acc_ref[...] = jnp.zeros_like(acc_ref)

    acc_ref[...] += jnp.dot(a_ref[...], b_ref[...],
                            preferred_element_type=jnp.float32)

    @pl.when(pl.program_id(2) == pl.num_programs(2) - 1)
    def _finalize():
        # Bias add lives in the (mem-bound) matmul epilogue, not the serial loop.
        o_ref[...] = (acc_ref[...] + bias_ref[...]).astype(o_ref.dtype)


def _pick_tile(dim, prefs):
    """Largest preferred tile that divides `dim`; else the full dim."""
    for p in prefs:
        if dim >= p and dim % p == 0:
            return p
    return dim


def matmul_bias(a, b, bias):
    """a: (M, K), b: (K, N), bias: (1, N)  ->  (M, N) float32."""
    M, K = a.shape
    _, N = b.shape
    tm = _pick_tile(M, (256, 128, 64, 32, 16, 8))   # multiples of 8 (sublane)
    tn = _pick_tile(N, (512, 256, 128))             # multiples of 128 (lane)
    tk = _pick_tile(K, (512, 256, 128))
    grid = (M // tm, N // tn, K // tk)

    return pl.pallas_call(
        _matmul_bias_kernel,
        out_shape=jax.ShapeDtypeStruct((M, N), jnp.float32),
        grid_spec=pltpu.PrefetchScalarGridSpec(
            num_scalar_prefetch=0,
            grid=grid,
            in_specs=[
                pl.BlockSpec((tm, tk), lambda i, j, k: (i, k)),
                pl.BlockSpec((tk, tn), lambda i, j, k: (k, j)),
                pl.BlockSpec((1, tn), lambda i, j, k: (0, j)),
            ],
            out_specs=pl.BlockSpec((tm, tn), lambda i, j, k: (i, j)),
            scratch_shapes=[pltpu.VMEM((tm, tn), jnp.float32)],
        ),
        compiler_params=pltpu.CompilerParams(
            dimension_semantics=("parallel", "parallel", "arbitrary")),
    )(a, b, bias)


# ----------------------------------------------------------------------------
# Sequential LSTM recurrence. Single program; only h @ w_h^T is serial.
#   gx_ref : (T, B, 4H)  precomputed  x @ w_x.T + hstack(b_i,b_f,b_o,b_g)
#   wh_ref : (H, 4H)     pre-transposed w_h
#   h_out  : (T, B, H)   hidden states for every step
# ----------------------------------------------------------------------------
def _lstm_recurrence_kernel(gx_ref, wh_ref, h_out_ref):
    T, B, _ = gx_ref.shape
    H = h_out_ref.shape[2]

    def step(t, carry):
        h, c = carry
        gates = gx_ref[t] + jnp.dot(h, wh_ref[...],
                                    preferred_element_type=jnp.float32)
        # torch.chunk(gates, 4, dim=1) order: i, f, o, g
        i_g = jax.nn.sigmoid(gates[:, 0 * H:1 * H])
        f_g = jax.nn.sigmoid(gates[:, 1 * H:2 * H])
        o_g = jax.nn.sigmoid(gates[:, 2 * H:3 * H])
        g_g = jnp.tanh(gates[:, 3 * H:4 * H])
        c_new = g_g * i_g + c * f_g
        h_new = jnp.tanh(c_new) * o_g
        h_out_ref[t] = h_new
        return (h_new, c_new)

    h0 = jnp.zeros((B, H), jnp.float32)
    c0 = jnp.zeros((B, H), jnp.float32)
    lax.fori_loop(0, T, step, (h0, c0), unroll=(T <= 16))


def lstm_recurrence(gx, wh_t):
    # NOTE: the whole (T, B, 4H) gate slab is VMEM-resident; for very long
    # sequences this would be tiled over T chunks with h/c carried in scratch.
    T, B, H4 = gx.shape
    H = wh_t.shape[0]
    return pl.pallas_call(
        _lstm_recurrence_kernel,
        out_shape=jax.ShapeDtypeStruct((T, B, H), jnp.float32),
        grid_spec=pltpu.PrefetchScalarGridSpec(
            num_scalar_prefetch=0,
            grid=(1,),
            in_specs=[
                pl.BlockSpec((T, B, H4), lambda i: (0, 0, 0)),
                pl.BlockSpec((H, H4), lambda i: (0, 0)),
            ],
            out_specs=pl.BlockSpec((T, B, H), lambda i: (0, 0, 0)),
        ),
        compiler_params=pltpu.CompilerParams(
            dimension_semantics=("arbitrary",)),
    )(gx, wh_t)


# ----------------------------------------------------------------------------
# Full forward pass of TextGenerationModel.
# ----------------------------------------------------------------------------
@jax.jit
def text_generation_forward(x_ids, emb_table, w_x, w_h, bias_ifog, w_lin, b_lin):
    """x_ids: (T, B) int32  ->  logits (T, B, V) float32."""
    T, B = x_ids.shape
    E = emb_table.shape[1]
    H = w_h.shape[1]
    V = w_lin.shape[0]

    # Pad batch to a multiple of 8 (sublane-full) and vocab to a multiple of
    # 128 (lane-dense output stores). Padding is sliced off at the end.
    Bp = ((B + 7) // 8) * 8
    Vp = ((V + 127) // 128) * 128

    # Embedding lookup (gather) stays in JAX glue.
    embeds = emb_table[x_ids]                               # (T, B, E)
    if Bp != B:
        embeds = jnp.pad(embeds, ((0, 0), (0, Bp - B), (0, 0)))

    # One-time weight transposes (contraction-friendly layouts, no in-kernel .T).
    wx_t = w_x.T                                            # (E, 4H)
    wh_t = w_h.T                                            # (H, 4H)
    wl_t = w_lin.T                                          # (H, V)
    b_lin_p = b_lin
    if Vp != V:
        wl_t = jnp.pad(wl_t, ((0, 0), (0, Vp - V)))
        b_lin_p = jnp.pad(b_lin, (0, Vp - V))

    # 1) Hoisted input projection over all T*Bp rows (fully parallel matmul).
    gx = matmul_bias(embeds.reshape(T * Bp, E), wx_t,
                     bias_ifog.reshape(1, 4 * H))           # (T*Bp, 4H)
    gx = gx.reshape(T, Bp, 4 * H)

    # 2) Serial recurrence: only h @ w_h.T per step.
    h_seq = lstm_recurrence(gx, wh_t)                       # (T, Bp, H)

    # 3) Hoisted vocab projection over all T*Bp rows (fully parallel matmul).
    logits = matmul_bias(h_seq.reshape(T * Bp, H), wl_t,
                         b_lin_p.reshape(1, Vp))            # (T*Bp, Vp)
    logits = logits.reshape(T, Bp, Vp)[:, :B, :V]
    return logits


# ----------------------------------------------------------------------------
# Parameter init mirroring the PyTorch module, and a pure-JAX reference.
# ----------------------------------------------------------------------------
def init_params(key, vocab_size, embed_size, hidden_dim):
    k_emb, k_wx, k_wh, k_bi, k_bf, k_bo, k_bg, k_wl, k_bl = jax.random.split(key, 9)
    bound = 1.0 / math.sqrt(hidden_dim)

    emb_table = jax.random.normal(k_emb, (vocab_size, embed_size), jnp.float32)

    w_x = jax.random.uniform(k_wx, (4 * hidden_dim, embed_size), jnp.float32, -bound, bound)
    w_h = jax.random.uniform(k_wh, (4 * hidden_dim, hidden_dim), jnp.float32, -bound, bound)
    b_i = jax.random.uniform(k_bi, (hidden_dim,), jnp.float32, -bound, bound)
    b_f = jax.random.uniform(k_bf, (hidden_dim,), jnp.float32, -bound, bound) + 1.0  # b_f += 1
    b_o = jax.random.uniform(k_bo, (hidden_dim,), jnp.float32, -bound, bound)
    b_g = jax.random.uniform(k_bg, (hidden_dim,), jnp.float32, -bound, bound)
    # torch.hstack((b_i, b_f, b_o, b_g)) matches torch.chunk order i, f, o, g
    bias_ifog = jnp.concatenate([b_i, b_f, b_o, b_g], axis=0)

    w_lin = jax.random.uniform(k_wl, (vocab_size, hidden_dim), jnp.float32, -bound, bound)
    b_lin = jax.random.uniform(k_bl, (vocab_size,), jnp.float32, -bound, bound)
    return emb_table, w_x, w_h, bias_ifog, w_lin, b_lin


def reference_forward(x_ids, emb_table, w_x, w_h, bias_ifog, w_lin, b_lin):
    T, B = x_ids.shape
    H = w_h.shape[1]
    embeds = emb_table[x_ids]

    def step(carry, x_t):
        h, c = carry
        gates = x_t @ w_x.T + h @ w_h.T + bias_ifog
        i_g = jax.nn.sigmoid(gates[:, 0 * H:1 * H])
        f_g = jax.nn.sigmoid(gates[:, 1 * H:2 * H])
        o_g = jax.nn.sigmoid(gates[:, 2 * H:3 * H])
        g_g = jnp.tanh(gates[:, 3 * H:4 * H])
        c = g_g * i_g + c * f_g
        h = jnp.tanh(c) * o_g
        return (h, c), h @ w_lin.T + b_lin

    h0 = jnp.zeros((B, H), jnp.float32)
    c0 = jnp.zeros((B, H), jnp.float32)
    _, out = jax.lax.scan(step, (h0, c0), embeds)
    return out


if __name__ == "__main__":
    # Small shapes consistent with the module: seq=8, batch=2, vocab=32,
    # embedding=32, lstm_hidden=32.
    SEQ_LEN, BATCH = 8, 2
    VOCAB, EMBED, HIDDEN = 32, 32, 32

    key = jax.random.PRNGKey(0)
    k_params, k_x = jax.random.split(key)

    params = init_params(k_params, VOCAB, EMBED, HIDDEN)
    x_ids = jax.random.randint(k_x, (SEQ_LEN, BATCH), 0, VOCAB, dtype=jnp.int32)

    out = text_generation_forward(x_ids, *params)
    out = jax.block_until_ready(out)

    ref = reference_forward(x_ids, *params)
    assert out.shape == (SEQ_LEN, BATCH, VOCAB), out.shape
    assert jnp.allclose(out, ref, atol=1e-5, rtol=1e-5), "mismatch vs. reference"

    print("KERNEL_OK")
</pallas_src>

<mosaic_0001>
module attributes {stable_mosaic.version = 11 : i64} {
  func.func @_matmul_bias_kernel(%arg0: i32, %arg1: i32, %arg2: i32, %arg3: memref<64x32xf32, #tpu.memory_space<vmem>>, %arg4: memref<32x128xf32, #tpu.memory_space<vmem>>, %arg5: memref<1x128xf32, #tpu.memory_space<vmem>>, %arg6: memref<64x128xf32, #tpu.memory_space<vmem>>, %arg7: memref<64x128xf32, #tpu.memory_space<vmem>>) attributes {dimension_semantics = [#tpu.dimension_semantics<parallel>, #tpu.dimension_semantics<parallel>, #tpu.dimension_semantics<arbitrary>], iteration_bounds = array<i64: 1, 1, 1>, scalar_prefetch = 0 : i64, scratch_operands = 1 : i64, tpu.core_type = #tpu.core_type<tc>, window_params = [{transform_indices = @transform_0, window_bounds = array<i64: 64, 32>}, {transform_indices = @transform_1, window_bounds = array<i64: 32, 128>}, {transform_indices = @transform_2, window_bounds = array<i64: 1, 128>}, {transform_indices = @transform_3, window_bounds = array<i64: 64, 128>}]} {
    %c0_i32 = arith.constant 0 : i32
    %0 = arith.cmpi eq, %arg2, %c0_i32 : i32
    %1 = arith.extui %0 : i1 to i32
    %c0_i32_0 = arith.constant 0 : i32
    %2 = arith.cmpi ne, %1, %c0_i32_0 : i32
    scf.if %2 {
      %cst_10 = arith.constant 0.000000e+00 : f32
      %12 = vector.broadcast %cst_10 : f32 to vector<64x128xf32>
      %c0_11 = arith.constant 0 : index
      %c0_12 = arith.constant 0 : index
      %13 = vector.load %arg7[%c0_11, %c0_12] : memref<64x128xf32, #tpu.memory_space<vmem>>, vector<64x128xf32>
      tpu.vector_store %arg7[%c0_11, %c0_12], %12 {strides = array<i32>} : memref<64x128xf32, #tpu.memory_space<vmem>>, vector<64x128xf32>,
    } else {
    }
    %c0 = arith.constant 0 : index
    %c0_1 = arith.constant 0 : index
    %3 = vector.load %arg7[%c0, %c0_1] : memref<64x128xf32, #tpu.memory_space<vmem>>, vector<64x128xf32>
    %c0_2 = arith.constant 0 : index
    %c0_3 = arith.constant 0 : index
    %4 = vector.load %arg3[%c0_2, %c0_3] : memref<64x32xf32, #tpu.memory_space<vmem>>, vector<64x32xf32>
    %c0_4 = arith.constant 0 : index
    %c0_5 = arith.constant 0 : index
    %5 = vector.load %arg4[%c0_4, %c0_5] : memref<32x128xf32, #tpu.memory_space<vmem>>, vector<32x128xf32>
    %cst = arith.constant dense<0.000000e+00> : vector<64x128xf32>
    %6 = tpu.matmul %4, %5, %cst {dimension_numbers = #tpu.dot_dimension_numbers<[1], [0], [0], [1], [0, 0, 1, 1], [], []>} : vector<64x32xf32>, vector<32x128xf32>, vector<64x128xf32> -> vector<64x128xf32>
    %7 = arith.addf %3, %6 : vector<64x128xf32>
    %c0_6 = arith.constant 0 : index
    %c0_7 = arith.constant 0 : index
    %8 = vector.load %arg7[%c0_6, %c0_7] : memref<64x128xf32, #tpu.memory_space<vmem>>, vector<64x128xf32>
    tpu.vector_store %arg7[%c0_6, %c0_7], %7 {strides = array<i32>} : memref<64x128xf32, #tpu.memory_space<vmem>>, vector<64x128xf32>,
    %c0_i32_8 = arith.constant 0 : i32
    %9 = arith.cmpi eq, %arg2, %c0_i32_8 : i32
    %10 = arith.extui %9 : i1 to i32
    %c0_i32_9 = arith.constant 0 : i32
    %11 = arith.cmpi ne, %10, %c0_i32_9 : i32
    scf.if %11 {
      %c0_10 = arith.constant 0 : index
      %c0_11 = arith.constant 0 : index
      %12 = vector.load %arg7[%c0_10, %c0_11] : memref<64x128xf32, #tpu.memory_space<vmem>>, vector<64x128xf32>
      %c0_12 = arith.constant 0 : index
      %c0_13 = arith.constant 0 : index
      %13 = vector.load %arg5[%c0_12, %c0_13] : memref<1x128xf32, #tpu.memory_space<vmem>>, vector<1x128xf32>
      %14 = vector.broadcast %13 : vector<1x128xf32> to vector<64x128xf32>
      %15 = arith.addf %12, %14 : vector<64x128xf32>
      %c0_14 = arith.constant 0 : index
      %c0_15 = arith.constant 0 : index
      %16 = vector.load %arg6[%c0_14, %c0_15] : memref<64x128xf32, #tpu.memory_space<vmem>>, vector<64x128xf32>
      tpu.vector_store %arg6[%c0_14, %c0_15], %15 {strides = array<i32>} : memref<64x128xf32, #tpu.memory_space<vmem>>, vector<64x128xf32>,
    } else {
    }
    return
  }
  func.func @transform_0(%arg0: i32, %arg1: i32, %arg2: i32) -> (i32, i32) {
    %c0_i32 = arith.constant 0 : i32
    return %arg0, %arg2 : i32, i32
  }
  func.func @transform_1(%arg0: i32, %arg1: i32, %arg2: i32) -> (i32, i32) {
    %c0_i32 = arith.constant 0 : i32
    return %arg2, %arg1 : i32, i32
  }
  func.func @transform_2(%arg0: i32, %arg1: i32, %arg2: i32) -> (i32, i32) {
    %c0_i32 = arith.constant 0 : i32
    %c0_i32_0 = arith.constant 0 : i32
    return %c0_i32, %arg1 : i32, i32
  }
  func.func @transform_3(%arg0: i32, %arg1: i32, %arg2: i32) -> (i32, i32) {
    %c0_i32 = arith.constant 0 : i32
    return %arg0, %arg1 : i32, i32
  }
}

module attributes {stable_mosaic.version = 11 : i64} {
  func.func @_lstm_recurrence_kernel(%arg0: i32, %arg1: memref<8x8x128xf32, #tpu.memory_space<vmem>>, %arg2: memref<32x128xf32, #tpu.memory_space<vmem>>, %arg3: memref<8x8x32xf32, #tpu.memory_space<vmem>>) attributes {dimension_semantics = [#tpu.dimension_semantics<arbitrary>], iteration_bounds = array<i64: 1>, scalar_prefetch = 0 : i64, scratch_operands = 0 : i64, tpu.core_type = #tpu.core_type<tc>, window_params = [{pipeline_mode = #tpu.pipeline_mode<synchronous>, transform_indices = @transform_0, window_bounds = array<i64: 8, 8, 128>}, {pipeline_mode = #tpu.pipeline_mode<synchronous>, transform_indices = @transform_1, window_bounds = array<i64: 32, 128>}, {pipeline_mode = #tpu.pipeline_mode<synchronous>, transform_indices = @transform_2, window_bounds = array<i64: 8, 8, 32>}]} {
    %cst = arith.constant 0.000000e+00 : f32
    %0 = vector.broadcast %cst : f32 to vector<8x32xf32>
    %cst_0 = arith.constant 0.000000e+00 : f32
    %1 = vector.broadcast %cst_0 : f32 to vector<8x32xf32>
    %c0_i32 = arith.constant 0 : i32
    %2 = arith.index_cast %c0_i32 : i32 to index
    %c0 = arith.constant 0 : index
    %c0_1 = arith.constant 0 : index
    %3 = vector.load %arg1[%2, %c0, %c0_1] : memref<8x8x128xf32, #tpu.memory_space<vmem>>, vector<1x8x128xf32>
    %4 = vector.shape_cast %3 : vector<1x8x128xf32> to vector<8x128xf32>
    %c0_2 = arith.constant 0 : index
    %c0_3 = arith.constant 0 : index
    %5 = vector.load %arg2[%c0_2, %c0_3] : memref<32x128xf32, #tpu.memory_space<vmem>>, vector<32x128xf32>
    %cst_4 = arith.constant dense<0.000000e+00> : vector<8x128xf32>
    %6 = tpu.matmul %0, %5, %cst_4 {dimension_numbers = #tpu.dot_dimension_numbers<[1], [0], [0], [1], [0, 0, 1, 1], [], []>} : vector<8x32xf32>, vector<32x128xf32>, vector<8x128xf32> -> vector<8x128xf32>
    %7 = arith.addf %4, %6 : vector<8x128xf32>
    %8 = vector.extract_strided_slice %7 {offsets = [0, 0], sizes = [8, 32], strides = [1, 1]} : vector<8x128xf32> to vector<8x32xf32>
    %9 = arith.negf %8 : vector<8x32xf32>
    %10 = math.exp %9 : vector<8x32xf32>
    %cst_5 = arith.constant 1.000000e+00 : f32
    %11 = vector.broadcast %cst_5 : f32 to vector<8x32xf32>
    %12 = arith.addf %11, %10 : vector<8x32xf32>
    %13 = arith.divf %11, %12 : vector<8x32xf32>
    %14 = vector.extract_strided_slice %7 {offsets = [0, 32], sizes = [8, 32], strides = [1, 1]} : vector<8x128xf32> to vector<8x32xf32>
    %15 = arith.negf %14 : vector<8x32xf32>
    %16 = math.exp %15 : vector<8x32xf32>
    %cst_6 = arith.constant 1.000000e+00 : f32
    %17 = vector.broadcast %cst_6 : f32 to vector<8x32xf32>
    %18 = arith.addf %17, %16 : vector<8x32xf32>
    %19 = arith.divf %17, %18 : vector<8x32xf32>
    %20 = vector.extract_strided_slice %7 {offsets = [0, 64], sizes = [8, 32], strides = [1, 1]} : vector<8x128xf32> to vector<8x32xf32>
    %21 = arith.negf %20 : vector<8x32xf32>
    %22 = math.exp %21 : vector<8x32xf32>
    %cst_7 = arith.constant 1.000000e+00 : f32
    %23 = vector.broadcast %cst_7 : f32 to vector<8x32xf32>
    %24 = arith.addf %23, %22 : vector<8x32xf32>
    %25 = arith.divf %23, %24 : vector<8x32xf32>
    %26 = vector.extract_strided_slice %7 {offsets = [0, 96], sizes = [8, 32], strides = [1, 1]} : vector<8x128xf32> to vector<8x32xf32>
    %27 = math.tanh %26 : vector<8x32xf32>
    %28 = arith.mulf %27, %13 : vector<8x32xf32>
    %29 = arith.mulf %1, %19 : vector<8x32xf32>
    %30 = arith.addf %28, %29 : vector<8x32xf32>
    %31 = math.tanh %30 : vector<8x32xf32>
    %32 = arith.mulf %31, %25 : vector<8x32xf32>
    %33 = arith.index_cast %c0_i32 : i32 to index
    %c0_8 = arith.constant 0 : index
    %c0_9 = arith.constant 0 : index
    %34 = vector.load %arg3[%33, %c0_8, %c0_9] : memref<8x8x32xf32, #tpu.memory_space<vmem>>, vector<1x8x32xf32>
    %35 = vector.shape_cast %34 : vector<1x8x32xf32> to vector<8x32xf32>
    %36 = vector.shape_cast %32 : vector<8x32xf32> to vector<1x8x32xf32>
    tpu.vector_store %arg3[%33, %c0_8, %c0_9], %36 {strides = array<i32>} : memref<8x8x32xf32, #tpu.memory_space<vmem>>, vector<1x8x32xf32>,
    %c1_i32 = arith.constant 1 : i32
    %37 = arith.index_cast %c1_i32 : i32 to index
    %c0_10 = arith.constant 0 : index
    %c0_11 = arith.constant 0 : index
    %38 = vector.load %arg1[%37, %c0_10, %c0_11] : memref<8x8x128xf32, #tpu.memory_space<vmem>>, vector<1x8x128xf32>
    %39 = vector.shape_cast %38 : vector<1x8x128xf32> to vector<8x128xf32>
    %c0_12 = arith.constant 0 : index
    %c0_13 = arith.constant 0 : index
    %40 = vector.load %arg2[%c0_12, %c0_13] : memref<32x128xf32, #tpu.memory_space<vmem>>, vector<32x128xf32>
    %cst_14 = arith.constant dense<0.000000e+00> : vector<8x128xf32>
    %41 = tpu.matmul %32, %40, %cst_14 {dimension_numbers = #tpu.dot_dimension_numbers<[1], [0], [0], [1], [0, 0, 1, 1], [], []>} : vector<8x32xf32>, vector<32x128xf32>, vector<8x128xf32> -> vector<8x128xf32>
    %42 = arith.addf %39, %41 : vector<8x128xf32>
    %43 = vector.extract_strided_slice %42 {offsets = [0, 0], sizes = [8, 32], strides = [1, 1]} : vector<8x128xf32> to vector<8x32xf32>
    %44 = arith.negf %43 : vector<8x32xf32>
    %45 = math.exp %44 : vector<8x32xf32>
    %cst_15 = arith.constant 1.000000e+00 : f32
    %46 = vector.broadcast %cst_15 : f32 to vector<8x32xf32>
    %47 = arith.addf %46, %45 : vector<8x32xf32>
    %48 = arith.divf %46, %47 : vector<8x32xf32>
    %49 = vector.extract_strided_slice %42 {offsets = [0, 32], sizes = [8, 32], strides = [1, 1]} : vector<8x128xf32> to vector<8x32xf32>
    %50 = arith.negf %49 : vector<8x32xf32>
    %51 = math.exp %50 : vector<8x32xf32>
    %cst_16 = arith.constant 1.000000e+00 : f32
    %52 = vector.broadcast %cst_16 : f32 to vector<8x32xf32>
    %53 = arith.addf %52, %51 : vector<8x32xf32>
    %54 = arith.divf %52, %53 : vector<8x32xf32>
    %55 = vector.extract_strided_slice %42 {offsets = [0, 64], sizes = [8, 32], strides = [1, 1]} : vector<8x128xf32> to vector<8x32xf32>
    %56 = arith.negf %55 : vector<8x32xf32>
    %57 = math.exp %56 : vector<8x32xf32>
    %cst_17 = arith.constant 1.000000e+00 : f32
    %58 = vector.broadcast %cst_17 : f32 to vector<8x32xf32>
    %59 = arith.addf %58, %57 : vector<8x32xf32>
    %60 = arith.divf %58, %59 : vector<8x32xf32>
    %61 = vector.extract_strided_slice %42 {offsets = [0, 96], sizes = [8, 32], strides = [1, 1]} : vector<8x128xf32> to vector<8x32xf32>
    %62 = math.tanh %61 : vector<8x32xf32>
    %63 = arith.mulf %62, %48 : vector<8x32xf32>
    %64 = arith.mulf %30, %54 : vector<8x32xf32>
    %65 = arith.addf %63, %64 : vector<8x32xf32>
    %66 = math.tanh %65 : vector<8x32xf32>
    %67 = arith.mulf %66, %60 : vector<8x32xf32>
    %68 = arith.index_cast %c1_i32 : i32 to index
    %c0_18 = arith.constant 0 : index
    %c0_19 = arith.constant 0 : index
    %69 = vector.load %arg3[%68, %c0_18, %c0_19] : memref<8x8x32xf32, #tpu.memory_space<vmem>>, vector<1x8x32xf32>
    %70 = vector.shape_cast %69 : vector<1x8x32xf32> to vector<8x32xf32>
    %71 = vector.shape_cast %67 : vector<8x32xf32> to vector<1x8x32xf32>
    tpu.vector_store %arg3[%68, %c0_18, %c0_19], %71 {strides = array<i32>} : memref<8x8x32xf32, #tpu.memory_space<vmem>>, vector<1x8x32xf32>,
    %c2_i32 = arith.constant 2 : i32
    %72 = arith.index_cast %c2_i32 : i32 to index
    %c0_20 = arith.constant 0 : index
    %c0_21 = arith.constant 0 : index
    %73 = vector.load %arg1[%72, %c0_20, %c0_21] : memref<8x8x128xf32, #tpu.memory_space<vmem>>, vector<1x8x128xf32>
    %74 = vector.shape_cast %73 : vector<1x8x128xf32> to vector<8x128xf32>
    %c0_22 = arith.constant 0 : index
    %c0_23 = arith.constant 0 : index
    %75 = vector.load %arg2[%c0_22, %c0_23] : memref<32x128xf32, #tpu.memory_space<vmem>>, vector<32x128xf32>
    %cst_24 = arith.constant dense<0.000000e+00> : vector<8x128xf32>
    %76 = tpu.matmul %67, %75, %cst_24 {dimension_numbers = #tpu.dot_dimension_numbers<[1], [0], [0], [1], [0, 0, 1, 1], [], []>} : vector<8x32xf32>, vector<32x128xf32>, vector<8x128xf32> -> vector<8x128xf32>
    %77 = arith.addf %74, %76 : vector<8x128xf32>
    %78 = vector.extract_strided_slice %77 {offsets = [0, 0], sizes = [8, 32], strides = [1, 1]} : vector<8x128xf32> to vector<8x32xf32>
    %79 = arith.negf %78 : vector<8x32xf32>
    %80 = math.exp %79 : vector<8x32xf32>
    %cst_25 = arith.constant 1.000000e+00 : f32
    %81 = vector.broadcast %cst_25 : f32 to vector<8x32xf32>
    %82 = arith.addf %81, %80 : vector<8x32xf32>
    %83 = arith.divf %81, %82 : vector<8x32xf32>
    %84 = vector.extract_strided_slice %77 {offsets = [0, 32], sizes = [8, 32], strides = [1, 1]} : vector<8x128xf32> to vector<8x32xf32>
    %85 = arith.negf %84 : vector<8x32xf32>
    %86 = math.exp %85 : vector<8x32xf32>
    %cst_26 = arith.constant 1.000000e+00 : f32
    %87 = vector.broadcast %cst_26 : f32 to vector<8x32xf32>
    %88 = arith.addf %87, %86 : vector<8x32xf32>
    %89 = arith.divf %87, %88 : vector<8x32xf32>
    %90 = vector.extract_strided_slice %77 {offsets = [0, 64], sizes = [8, 32], strides = [1, 1]} : vector<8x128xf32> to vector<8x32xf32>
    %91 = arith.negf %90 : vector<8x32xf32>
    %92 = math.exp %91 : vector<8x32xf32>
    %cst_27 = arith.constant 1.000000e+00 : f32
    %93 = vector.broadcast %cst_27 : f32 to vector<8x32xf32>
    %94 = arith.addf %93, %92 : vector<8x32xf32>
    %95 = arith.divf %93, %94 : vector<8x32xf32>
    %96 = vector.extract_strided_slice %77 {offsets = [0, 96], sizes = [8, 32], strides = [1, 1]} : vector<8x128xf32> to vector<8x32xf32>
    %97 = math.tanh %96 : vector<8x32xf32>
    %98 = arith.mulf %97, %83 : vector<8x32xf32>
    %99 = arith.mulf %65, %89 : vector<8x32xf32>
    %100 = arith.addf %98, %99 : vector<8x32xf32>
    %101 = math.tanh %100 : vector<8x32xf32>
    %102 = arith.mulf %101, %95 : vector<8x32xf32>
    %103 = arith.index_cast %c2_i32 : i32 to index
    %c0_28 = arith.constant 0 : index
    %c0_29 = arith.constant 0 : index
    %104 = vector.load %arg3[%103, %c0_28, %c0_29] : memref<8x8x32xf32, #tpu.memory_space<vmem>>, vector<1x8x32xf32>
    %105 = vector.shape_cast %104 : vector<1x8x32xf32> to vector<8x32xf32>
    %106 = vector.shape_cast %102 : vector<8x32xf32> to vector<1x8x32xf32>
    tpu.vector_store %arg3[%103, %c0_28, %c0_29], %106 {strides = array<i32>} : memref<8x8x32xf32, #tpu.memory_space<vmem>>, vector<1x8x32xf32>,
    %c3_i32 = arith.constant 3 : i32
    %107 = arith.index_cast %c3_i32 : i32 to index
    %c0_30 = arith.constant 0 : index
    %c0_31 = arith.constant 0 : index
    %108 = vector.load %arg1[%107, %c0_30, %c0_31] : memref<8x8x128xf32, #tpu.memory_space<vmem>>, vector<1x8x128xf32>
    %109 = vector.shape_cast %108 : vector<1x8x128xf32> to vector<8x128xf32>
    %c0_32 = arith.constant 0 : index
    %c0_33 = arith.constant 0 : index
    %110 = vector.load %arg2[%c0_32, %c0_33] : memref<32x128xf32, #tpu.memory_space<vmem>>, vector<32x128xf32>
    %cst_34 = arith.constant dense<0.000000e+00> : vector<8x128xf32>
    %111 = tpu.matmul %102, %110, %cst_34 {dimension_numbers = #tpu.dot_dimension_numbers<[1], [0], [0], [1], [0, 0, 1, 1], [], []>} : vector<8x32xf32>, vector<32x128xf32>, vector<8x128xf32> -> vector<8x128xf32>
    %112 = arith.addf %109, %111 : vector<8x128xf32>
    %113 = vector.extract_strided_slice %112 {offsets = [0, 0], sizes = [8, 32], strides = [1, 1]} : vector<8x128xf32> to vector<8x32xf32>
    %114 = arith.negf %113 : vector<8x32xf32>
    %115 = math.exp %114 : vector<8x32xf32>
    %cst_35 = arith.constant 1.000000e+00 : f32
    %116 = vector.broadcast %cst_35 : f32 to vector<8x32xf32>
    %117 = arith.addf %116, %115 : vector<8x32xf32>
    %118 = arith.divf %116, %117 : vector<8x32xf32>
    %119 = vector.extract_strided_slice %112 {offsets = [0, 32], sizes = [8, 32], strides = [1, 1]} : vector<8x128xf32> to vector<8x32xf32>
    %120 = arith.negf %119 : vector<8x32xf32>
    %121 = math.exp %120 : vector<8x32xf32>
    %cst_36 = arith.constant 1.000000e+00 : f32
    %122 = vector.broadcast %cst_36 : f32 to vector<8x32xf32>
    %123 = arith.addf %122, %121 : vector<8x32xf32>
    %124 = arith.divf %122, %123 : vector<8x32xf32>
    %125 = vector.extract_strided_slice %112 {offsets = [0, 64], sizes = [8, 32], strides = [1, 1]} : vector<8x128xf32> to vector<8x32xf32>
    %126 = arith.negf %125 : vector<8x32xf32>
    %127 = math.exp %126 : vector<8x32xf32>
    %cst_37 = arith.constant 1.000000e+00 : f32
    %128 = vector.broadcast %cst_37 : f32 to vector<8x32xf32>
    %129 = arith.addf %128, %127 : vector<8x32xf32>
    %130 = arith.divf %128, %129 : vector<8x32xf32>
    %131 = vector.extract_strided_slice %112 {offsets = [0, 96], sizes = [8, 32], strides = [1, 1]} : vector<8x128xf32> to vector<8x32xf32>
    %132 = math.tanh %131 : vector<8x32xf32>
    %133 = arith.mulf %132, %118 : vector<8x32xf32>
    %134 = arith.mulf %100, %124 : vector<8x32xf32>
    %135 = arith.addf %133, %134 : vector<8x32xf32>
    %136 = math.tanh %135 : vector<8x32xf32>
    %137 = arith.mulf %136, %130 : vector<8x32xf32>
    %138 = arith.index_cast %c3_i32 : i32 to index
    %c0_38 = arith.constant 0 : index
    %c0_39 = arith.constant 0 : index
    %139 = vector.load %arg3[%138, %c0_38, %c0_39] : memref<8x8x32xf32, #tpu.memory_space<vmem>>, vector<1x8x32xf32>
    %140 = vector.shape_cast %139 : vector<1x8x32xf32> to vector<8x32xf32>
    %141 = vector.shape_cast %137 : vector<8x32xf32> to vector<1x8x32xf32>
    tpu.vector_store %arg3[%138, %c0_38, %c0_39], %141 {strides = array<i32>} : memref<8x8x32xf32, #tpu.memory_space<vmem>>, vector<1x8x32xf32>,
    %c4_i32 = arith.constant 4 : i32
    %142 = arith.index_cast %c4_i32 : i32 to index
    %c0_40 = arith.constant 0 : index
    %c0_41 = arith.constant 0 : index
    %143 = vector.load %arg1[%142, %c0_40, %c0_41] : memref<8x8x128xf32, #tpu.memory_space<vmem>>, vector<1x8x128xf32>
    %144 = vector.shape_cast %143 : vector<1x8x128xf32> to vector<8x128xf32>
    %c0_42 = arith.constant 0 : index
    %c0_43 = arith.constant 0 : index
    %145 = vector.load %arg2[%c0_42, %c0_43] : memref<32x128xf32, #tpu.memory_space<vmem>>, vector<32x128xf32>
    %cst_44 = arith.constant dense<0.000000e+00> : vector<8x128xf32>
    %146 = tpu.matmul %137, %145, %cst_44 {dimension_numbers = #tpu.dot_dimension_numbers<[1], [0], [0], [1], [0, 0, 1, 1], [], []>} : vector<8x32xf32>, vector<32x128xf32>, vector<8x128xf32> -> vector<8x128xf32>
    %147 = arith.addf %144, %146 : vector<8x128xf32>
    %148 = vector.extract_strided_slice %147 {offsets = [0, 0], sizes = [8, 32], strides = [1, 1]} : vector<8x128xf32> to vector<8x32xf32>
    %149 = arith.negf %148 : vector<8x32xf32>
    %150 = math.exp %149 : vector<8x32xf32>
    %cst_45 = arith.constant 1.000000e+00 : f32
    %151 = vector.broadcast %cst_45 : f32 to vector<8x32xf32>
    %152 = arith.addf %151, %150 : vector<8x32xf32>
    %153 = arith.divf %151, %152 : vector<8x32xf32>
    %154 = vector.extract_strided_slice %147 {offsets = [0, 32], sizes = [8, 32], strides = [1, 1]} : vector<8x128xf32> to vector<8x32xf32>
    %155 = arith.negf %154 : vector<8x32xf32>
    %156 = math.exp %155 : vector<8x32xf32>
    %cst_46 = arith.constant 1.000000e+00 : f32
    %157 = vector.broadcast %cst_46 : f32 to vector<8x32xf32>
    %158 = arith.addf %157, %156 : vector<8x32xf32>
    %159 = arith.divf %157, %158 : vector<8x32xf32>
    %160 = vector.extract_strided_slice %147 {offsets = [0, 64], sizes = [8, 32], strides = [1, 1]} : vector<8x128xf32> to vector<8x32xf32>
    %161 = arith.negf %160 : vector<8x32xf32>
    %162 = math.exp %161 : vector<8x32xf32>
    %cst_47 = arith.constant 1.000000e+00 : f32
    %163 = vector.broadcast %cst_47 : f32 to vector<8x32xf32>
    %164 = arith.addf %163, %162 : vector<8x32xf32>
    %165 = arith.divf %163, %164 : vector<8x32xf32>
    %166 = vector.extract_strided_slice %147 {offsets = [0, 96], sizes = [8, 32], strides = [1, 1]} : vector<8x128xf32> to vector<8x32xf32>
    %167 = math.tanh %166 : vector<8x32xf32>
    %168 = arith.mulf %167, %153 : vector<8x32xf32>
    %169 = arith.mulf %135, %159 : vector<8x32xf32>
    %170 = arith.addf %168, %169 : vector<8x32xf32>
    %171 = math.tanh %170 : vector<8x32xf32>
    %172 = arith.mulf %171, %165 : vector<8x32xf32>
    %173 = arith.index_cast %c4_i32 : i32 to index
    %c0_48 = arith.constant 0 : index
    %c0_49 = arith.constant 0 : index
    %174 = vector.load %arg3[%173, %c0_48, %c0_49] : memref<8x8x32xf32, #tpu.memory_space<vmem>>, vector<1x8x32xf32>
    %175 = vector.shape_cast %174 : vector<1x8x32xf32> to vector<8x32xf32>
    %176 = vector.shape_cast %172 : vector<8x32xf32> to vector<1x8x32xf32>
    tpu.vector_store %arg3[%173, %c0_48, %c0_49], %176 {strides = array<i32>} : memref<8x8x32xf32, #tpu.memory_space<vmem>>, vector<1x8x32xf32>,
    %c5_i32 = arith.constant 5 : i32
    %177 = arith.index_cast %c5_i32 : i32 to index
    %c0_50 = arith.constant 0 : index
    %c0_51 = arith.constant 0 : index
    %178 = vector.load %arg1[%177, %c0_50, %c0_51] : memref<8x8x128xf32, #tpu.memory_space<vmem>>, vector<1x8x128xf32>
    %179 = vector.shape_cast %178 : vector<1x8x128xf32> to vector<8x128xf32>
    %c0_52 = arith.constant 0 : index
    %c0_53 = arith.constant 0 : index
    %180 = vector.load %arg2[%c0_52, %c0_53] : memref<32x128xf32, #tpu.memory_space<vmem>>, vector<32x128xf32>
    %cst_54 = arith.constant dense<0.000000e+00> : vector<8x128xf32>
    %181 = tpu.matmul %172, %180, %cst_54 {dimension_numbers = #tpu.dot_dimension_numbers<[1], [0], [0], [1], [0, 0, 1, 1], [], []>} : vector<8x32xf32>, vector<32x128xf32>, vector<8x128xf32> -> vector<8x128xf32>
    %182 = arith.addf %179, %181 : vector<8x128xf32>
    %183 = vector.extract_strided_slice %182 {offsets = [0, 0], sizes = [8, 32], strides = [1, 1]} : vector<8x128xf32> to vector<8x32xf32>
    %184 = arith.negf %183 : vector<8x32xf32>
    %185 = math.exp %184 : vector<8x32xf32>
    %cst_55 = arith.constant 1.000000e+00 : f32
    %186 = vector.broadcast %cst_55 : f32 to vector<8x32xf32>
    %187 = arith.addf %186, %185 : vector<8x32xf32>
    %188 = arith.divf %186, %187 : vector<8x32xf32>
    %189 = vector.extract_strided_slice %182 {offsets = [0, 32], sizes = [8, 32], strides = [1, 1]} : vector<8x128xf32> to vector<8x32xf32>
    %190 = arith.negf %189 : vector<8x32xf32>
    %191 = math.exp %190 : vector<8x32xf32>
    %cst_56 = arith.constant 1.000000e+00 : f32
    %192 = vector.broadcast %cst_56 : f32 to vector<8x32xf32>
    %193 = arith.addf %192, %191 : vector<8x32xf32>
    %194 = arith.divf %192, %193 : vector<8x32xf32>
    %195 = vector.extract_strided_slice %182 {offsets = [0, 64], sizes = [8, 32], strides = [1, 1]} : vector<8x128xf32> to vector<8x32xf32>
    %196 = arith.negf %195 : vector<8x32xf32>
    %197 = math.exp %196 : vector<8x32xf32>
    %cst_57 = arith.constant 1.000000e+00 : f32
    %198 = vector.broadcast %cst_57 : f32 to vector<8x32xf32>
    %199 = arith.addf %198, %197 : vector<8x32xf32>
    %200 = arith.divf %198, %199 : vector<8x32xf32>
    %201 = vector.extract_strided_slice %182 {offsets = [0, 96], sizes = [8, 32], strides = [1, 1]} : vector<8x128xf32> to vector<8x32xf32>
    %202 = math.tanh %201 : vector<8x32xf32>
    %203 = arith.mulf %202, %188 : vector<8x32xf32>
    %204 = arith.mulf %170, %194 : vector<8x32xf32>
    %205 = arith.addf %203, %204 : vector<8x32xf32>
    %206 = math.tanh %205 : vector<8x32xf32>
    %207 = arith.mulf %206, %200 : vector<8x32xf32>
    %208 = arith.index_cast %c5_i32 : i32 to index
    %c0_58 = arith.constant 0 : index
    %c0_59 = arith.constant 0 : index
    %209 = vector.load %arg3[%208, %c0_58, %c0_59] : memref<8x8x32xf32, #tpu.memory_space<vmem>>, vector<1x8x32xf32>
    %210 = vector.shape_cast %209 : vector<1x8x32xf32> to vector<8x32xf32>
    %211 = vector.shape_cast %207 : vector<8x32xf32> to vector<1x8x32xf32>
    tpu.vector_store %arg3[%208, %c0_58, %c0_59], %211 {strides = array<i32>} : memref<8x8x32xf32, #tpu.memory_space<vmem>>, vector<1x8x32xf32>,
    %c6_i32 = arith.constant 6 : i32
    %212 = arith.index_cast %c6_i32 : i32 to index
    %c0_60 = arith.constant 0 : index
    %c0_61 = arith.constant 0 : index
    %213 = vector.load %arg1[%212, %c0_60, %c0_61] : memref<8x8x128xf32, #tpu.memory_space<vmem>>, vector<1x8x128xf32>
    %214 = vector.shape_cast %213 : vector<1x8x128xf32> to vector<8x128xf32>
    %c0_62 = arith.constant 0 : index
    %c0_63 = arith.constant 0 : index
    %215 = vector.load %arg2[%c0_62, %c0_63] : memref<32x128xf32, #tpu.memory_space<vmem>>, vector<32x128xf32>
    %cst_64 = arith.constant dense<0.000000e+00> : vector<8x128xf32>
    %216 = tpu.matmul %207, %215, %cst_64 {dimension_numbers = #tpu.dot_dimension_numbers<[1], [0], [0], [1], [0, 0, 1, 1], [], []>} : vector<8x32xf32>, vector<32x128xf32>, vector<8x128xf32> -> vector<8x128xf32>
    %217 = arith.addf %214, %216 : vector<8x128xf32>
    %218 = vector.extract_strided_slice %217 {offsets = [0, 0], sizes = [8, 32], strides = [1, 1]} : vector<8x128xf32> to vector<8x32xf32>
    %219 = arith.negf %218 : vector<8x32xf32>
    %220 = math.exp %219 : vector<8x32xf32>
    %cst_65 = arith.constant 1.000000e+00 : f32
    %221 = vector.broadcast %cst_65 : f32 to vector<8x32xf32>
    %222 = arith.addf %221, %220 : vector<8x32xf32>
    %223 = arith.divf %221, %222 : vector<8x32xf32>
    %224 = vector.extract_strided_slice %217 {offsets = [0, 32], sizes = [8, 32], strides = [1, 1]} : vector<8x128xf32> to vector<8x32xf32>
    %225 = arith.negf %224 : vector<8x32xf32>
    %226 = math.exp %225 : vector<8x32xf32>
    %cst_66 = arith.constant 1.000000e+00 : f32
    %227 = vector.broadcast %cst_66 : f32 to vector<8x32xf32>
    %228 = arith.addf %227, %226 : vector<8x32xf32>
    %229 = arith.divf %227, %228 : vector<8x32xf32>
    %230 = vector.extract_strided_slice %217 {offsets = [0, 64], sizes = [8, 32], strides = [1, 1]} : vector<8x128xf32> to vector<8x32xf32>
    %231 = arith.negf %230 : vector<8x32xf32>
    %232 = math.exp %231 : vector<8x32xf32>
    %cst_67 = arith.constant 1.000000e+00 : f32
    %233 = vector.broadcast %cst_67 : f32 to vector<8x32xf32>
    %234 = arith.addf %233, %232 : vector<8x32xf32>
    %235 = arith.divf %233, %234 : vector<8x32xf32>
    %236 = vector.extract_strided_slice %217 {offsets = [0, 96], sizes = [8, 32], strides = [1, 1]} : vector<8x128xf32> to vector<8x32xf32>
    %237 = math.tanh %236 : vector<8x32xf32>
    %238 = arith.mulf %237, %223 : vector<8x32xf32>
    %239 = arith.mulf %205, %229 : vector<8x32xf32>
    %240 = arith.addf %238, %239 : vector<8x32xf32>
    %241 = math.tanh %240 : vector<8x32xf32>
    %242 = arith.mulf %241, %235 : vector<8x32xf32>
    %243 = arith.index_cast %c6_i32 : i32 to index
    %c0_68 = arith.constant 0 : index
    %c0_69 = arith.constant 0 : index
    %244 = vector.load %arg3[%243, %c0_68, %c0_69] : memref<8x8x32xf32, #tpu.memory_space<vmem>>, vector<1x8x32xf32>
    %245 = vector.shape_cast %244 : vector<1x8x32xf32> to vector<8x32xf32>
    %246 = vector.shape_cast %242 : vector<8x32xf32> to vector<1x8x32xf32>
    tpu.vector_store %arg3[%243, %c0_68, %c0_69], %246 {strides = array<i32>} : memref<8x8x32xf32, #tpu.memory_space<vmem>>, vector<1x8x32xf32>,
    %c7_i32 = arith.constant 7 : i32
    %247 = arith.index_cast %c7_i32 : i32 to index
    %c0_70 = arith.constant 0 : index
    %c0_71 = arith.constant 0 : index
    %248 = vector.load %arg1[%247, %c0_70, %c0_71] : memref<8x8x128xf32, #tpu.memory_space<vmem>>, vector<1x8x128xf32>
    %249 = vector.shape_cast %248 : vector<1x8x128xf32> to vector<8x128xf32>
    %c0_72 = arith.constant 0 : index
    %c0_73 = arith.constant 0 : index
    %250 = vector.load %arg2[%c0_72, %c0_73] : memref<32x128xf32, #tpu.memory_space<vmem>>, vector<32x128xf32>
    %cst_74 = arith.constant dense<0.000000e+00> : vector<8x128xf32>
    %251 = tpu.matmul %242, %250, %cst_74 {dimension_numbers = #tpu.dot_dimension_numbers<[1], [0], [0], [1], [0, 0, 1, 1], [], []>} : vector<8x32xf32>, vector<32x128xf32>, vector<8x128xf32> -> vector<8x128xf32>
    %252 = arith.addf %249, %251 : vector<8x128xf32>
    %253 = vector.extract_strided_slice %252 {offsets = [0, 0], sizes = [8, 32], strides = [1, 1]} : vector<8x128xf32> to vector<8x32xf32>
    %254 = arith.negf %253 : vector<8x32xf32>
    %255 = math.exp %254 : vector<8x32xf32>
    %cst_75 = arith.constant 1.000000e+00 : f32
    %256 = vector.broadcast %cst_75 : f32 to vector<8x32xf32>
    %257 = arith.addf %256, %255 : vector<8x32xf32>
    %258 = arith.divf %256, %257 : vector<8x32xf32>
    %259 = vector.extract_strided_slice %252 {offsets = [0, 32], sizes = [8, 32], strides = [1, 1]} : vector<8x128xf32> to vector<8x32xf32>
    %260 = arith.negf %259 : vector<8x32xf32>
    %261 = math.exp %260 : vector<8x32xf32>
    %cst_76 = arith.constant 1.000000e+00 : f32
    %262 = vector.broadcast %cst_76 : f32 to vector<8x32xf32>
    %263 = arith.addf %262, %261 : vector<8x32xf32>
    %264 = arith.divf %262, %263 : vector<8x32xf32>
    %265 = vector.extract_strided_slice %252 {offsets = [0, 64], sizes = [8, 32], strides = [1, 1]} : vector<8x128xf32> to vector<8x32xf32>
    %266 = arith.negf %265 : vector<8x32xf32>
    %267 = math.exp %266 : vector<8x32xf32>
    %cst_77 = arith.constant 1.000000e+00 : f32
    %268 = vector.broadcast %cst_77 : f32 to vector<8x32xf32>
    %269 = arith.addf %268, %267 : vector<8x32xf32>
    %270 = arith.divf %268, %269 : vector<8x32xf32>
    %271 = vector.extract_strided_slice %252 {offsets = [0, 96], sizes = [8, 32], strides = [1, 1]} : vector<8x128xf32> to vector<8x32xf32>
    %272 = math.tanh %271 : vector<8x32xf32>
    %273 = arith.mulf %272, %258 : vector<8x32xf32>
    %274 = arith.mulf %240, %264 : vector<8x32xf32>
    %275 = arith.addf %273, %274 : vector<8x32xf32>
    %276 = math.tanh %275 : vector<8x32xf32>
    %277 = arith.mulf %276, %270 : vector<8x32xf32>
    %278 = arith.index_cast %c7_i32 : i32 to index
    %c0_78 = arith.constant 0 : index
    %c0_79 = arith.constant 0 : index
    %279 = vector.load %arg3[%278, %c0_78, %c0_79] : memref<8x8x32xf32, #tpu.memory_space<vmem>>, vector<1x8x32xf32>
    %280 = vector.shape_cast %279 : vector<1x8x32xf32> to vector<8x32xf32>
    %281 = vector.shape_cast %277 : vector<8x32xf32> to vector<1x8x32xf32>
    tpu.vector_store %arg3[%278, %c0_78, %c0_79], %281 {strides = array<i32>} : memref<8x8x32xf32, #tpu.memory_space<vmem>>, vector<1x8x32xf32>,
    %c8_i32 = arith.constant 8 : i32
    return
  }
  func.func @transform_0(%arg0: i32) -> (i32, i32, i32) {
    %c0_i32 = arith.constant 0 : i32
    %c0_i32_0 = arith.constant 0 : i32
    %c0_i32_1 = arith.constant 0 : i32
    %c0_i32_2 = arith.constant 0 : i32
    return %c0_i32, %c0_i32_0, %c0_i32_1 : i32, i32, i32
  }
  func.func @transform_1(%arg0: i32) -> (i32, i32) {
    %c0_i32 = arith.constant 0 : i32
    %c0_i32_0 = arith.constant 0 : i32
    %c0_i32_1 = arith.constant 0 : i32
    return %c0_i32, %c0_i32_0 : i32, i32
  }
  func.func @transform_2(%arg0: i32) -> (i32, i32, i32) {
    %c0_i32 = arith.constant 0 : i32
    %c0_i32_0 = arith.constant 0 : i32
    %c0_i32_1 = arith.constant 0 : i32
    %c0_i32_2 = arith.constant 0 : i32
    return %c0_i32, %c0_i32_0, %c0_i32_1 : i32, i32, i32
  }
}

</mosaic_0001>

<bundles_post_ra>
// kernel: text_generation_forward.3
= control target key start
LH: loop header
LB: loop body
LE: loop exit
PB: predicated region body
PF: predicated region fallthrough
CT: control target
= control target key end

     0   :  { %vm46_vm0 = vcmask 261120   ;;  %s374_s1 = inlined_call_operand.vmem [shape: f32[32,128], index: 1, kind: input, shape index: {}]   ;;  %s375_s0 = inlined_call_operand.vmem [shape: f32[64,32], index: 0, kind: input, shape index: {}]   ;;  %s376_s2 = inlined_call_operand.vmem [shape: f32[1,128], index: 2, kind: input, shape index: {}]   ;;  %s377_s3 = inlined_call_operand.vmem [shape: f32[64,128], index: 3, kind: output, shape index: {}]  }
   0x1   :  { %v42_v0 = vld [vmem:[%s374_s1] sm:$0xff]  ;;  %v43_v1 = vld [vmem:[%s374_s1 + $0x8] sm:$0xff]  ;;  %v44_v2 = vld [vmem:[%s374_s1 + $0x10] sm:$0xff] }
   0x2   :  { %v271_v3 = vpack.c.bf16 %v43_v1, %v42_v0  ;;  %v45_v4 = vld [vmem:[%s374_s1 + $0x18] sm:$0xff]  ;;  %v34_v5 = vld [vmem:[%s375_s0] sm:$0xff]  ;;  %v35_v8 = vld [vmem:[%s375_s0 + $0x8] sm:$0xff] }
   0x3   :  { %v38_v6 = vld [vmem:[%s375_s0 + $0x20] sm:$0xff]  ;;  %v275_v7 = vpack.c.bf16 %v45_v4, %v44_v2  ;;  %259 = vmatprep.mubr.msk.f32.mxu0 %vm46_vm0, %v34_v5  ;;  %v39_v9 = vld [vmem:[%s375_s0 + $0x28] sm:$0xff]  ;;  %v36_v10 = vld [vmem:[%s375_s0 + $0x10] sm:$0xff] }
   0x4   :  { %265 = vmatprep.mubr.msk.f32.mxu1 %vm46_vm0, %v38_v6  ;;  %272 = vmatprep.subr.bf16.mxu0 %v271_v3  ;;  %v40_v11 = vld [vmem:[%s375_s0 + $0x30] sm:$0xff]  ;;  %v37_v12 = vld [vmem:[%s375_s0 + $0x18] sm:$0xff]  ;;  %v238_v14 = vld [vmem:[%s376_s2] ss:$0 sm:$0xff] }
   0x5   :  { %279 = vmatprep.subr.bf16.mxu1 %v271_v3  ;;  %274 = vmatpush3.bf16.msra.mxu0 %v271_v3  ;;  %v41_v13 = vld [vmem:[%s375_s0 + $0x38] sm:$0xff] }
   0x6   :  { %281 = vmatpush3.bf16.msra.mxu1 %v271_v3  ;;  %276 = vmatprep.subr.bf16.mxu0 %v275_v7 }
   0x7   :  { %280 = vmatprep.subr.bf16.mxu1 %v275_v7 }
   0x9   :  { %278 = vmatpush3.bf16.msra.mxu0 %v275_v7 }
   0xa   :  { %282 = vmatpush3.bf16.msra.mxu1 %v275_v7 }
   0xc   :  { %260 = vmatmul.mubr.msk.f32.vlgmr.msra.gmra.mrb[0].mxu0 %vm46_vm0, %v35_v8 }
   0xd   :  { %266 = vmatmul.mubr.msk.f32.vlgmr.msra.gmra.mrb[0].mxu1 %vm46_vm0, %v39_v9  ;;  %262 = vmatprep.mubr.msk.f32.mxu0 %vm46_vm0, %v36_v10 }
   0xe   :  { %268 = vmatprep.mubr.msk.f32.mxu1 %vm46_vm0, %v40_v11 }
  0x10   :  { %263 = vmatmul.mubr.msk.f32.gmra.mrb[2].mxu0 %vm46_vm0, %v37_v12 }
  0x11   :  { %269 = vmatmul.mubr.msk.f32.gmra.mrb[2].mxu1 %vm46_vm0, %v41_v13 }
  0xdf   :  { %v261_v15 = vpop.f32.mrb[0].mxu0 }
  0xe0   :  { %v267_v16 = vpop.f32.mrb[0].mxu1  ;;  %v211_v17 = vadd.f32 %v261_v15, %v238_v14  ;;  %v137_v19 = vpop.f32.mrb[1].mxu0 }
  0xe1   :  { %v215_v18 = vadd.f32 %v267_v16, %v238_v14  ;;  %v157_v20 = vpop.f32.mrb[1].mxu1  ;;  %v210_v21 = vadd.f32 %v238_v14, %v137_v19 }
  0xe2   :  { %v214_v22 = vadd.f32 %v238_v14, %v157_v20  ;;  %219 = vst [vmem:[%s377_s3 + $0x8] sm:$0xff] %v211_v17 }
  0xe3   :  { %223 = vst [vmem:[%s377_s3 + $0x28] sm:$0xff] %v215_v18  ;;  %218 = vst [vmem:[%s377_s3] sm:$0xff] %v210_v21  ;;  %v264_v23 = vpop.f32.mrb[2].mxu0 }
  0xe4   :  { %222 = vst [vmem:[%s377_s3 + $0x20] sm:$0xff] %v214_v22  ;;  %v270_v24 = vpop.f32.mrb[2].mxu1  ;;  %v213_v25 = vadd.f32 %v264_v23, %v238_v14  ;;  %v147_v27 = vpop.f32.mrb[3].mxu0 }
  0xe5   :  { %v217_v26 = vadd.f32 %v270_v24, %v238_v14  ;;  %v167_v28 = vpop.f32.mrb[3].mxu1  ;;  %v212_v29 = vadd.f32 %v238_v14, %v147_v27 }
  0xe6   :  { %v216_v30 = vadd.f32 %v238_v14, %v167_v28  ;;  %221 = vst [vmem:[%s377_s3 + $0x18] sm:$0xff] %v213_v25 }
  0xe7   :  { %225 = vst [vmem:[%s377_s3 + $0x38] sm:$0xff] %v217_v26  ;;  %220 = vst [vmem:[%s377_s3 + $0x10] sm:$0xff] %v212_v29 }
  0xe8   :  { %224 = vst [vmem:[%s377_s3 + $0x30] sm:$0xff] %v216_v30 }

// kernel: text_generation_forward.4
= control target key start
LH: loop header
LB: loop body
LE: loop exit
PB: predicated region body
PF: predicated region fallthrough
CT: control target
= control target key end

     0   :  { %v1147_v0 = vmov 0.0|0.0   ;;  %vm1148_vm0 = vmmov 0   ;;  %v1149_v4 = vmov 0.0   ;;  %s1150_s18 = smov 32   ;;  %s1151_s19 = smov 96   ;;  %vm16_vm1 = vcmask 261120   ;;  %s1328_s1 = inlined_call_operand.vmem [shape: f32[32,128], index: 1, kind: input, shape index: {}]   ;;  %s1329_s0 = inlined_call_operand.vmem [shape: f32[8,8,128], index: 0, kind: input, shape index: {}]   ;;  %s1330_s2 = inlined_call_operand.vmem [shape: f32[8,8,32], index: 2, kind: output, shape index: {}]  }
   0x1   :  { %1029 = vmatprep.subr.bf16.mxu0 %v1147_v0  ;;  %v12_v1 = vld [vmem:[%s1328_s1] sm:$0xff]  ;;  %v13_v2 = vld [vmem:[%s1328_s1 + $0x8] sm:$0xff]  ;;  %v14_v3 = vld [vmem:[%s1328_s1 + $0x10] sm:$0xff]  ;;  %949 = vmatprep.mubr.msk.f32.mxu0 %vm1148_vm0, %v1149_v4  ;;  %s1152_s20 = smov 64  }
   0x2   :  { %v1180_v5 = vpack.c.bf16 %v13_v2, %v12_v1  ;;  %v15_v6 = vld [vmem:[%s1328_s1 + $0x18] sm:$0xff]  ;;  %1035 = vmatprep.subr.bf16.mxu1 %v1147_v0  ;;  %960 = vmatprep.mubr.msk.f32.mxu1 %vm1148_vm0, %v1149_v4  ;;  %v11_v8 = vld [vmem:[%s1329_s0] sm:$0xff]  ;;  %v873_v26 = vld [vmem:[%s1329_s0 + $0x8] sm:$0xff] }
   0x3   :  { %v1189_v7 = vpack.c.bf16 %v15_v6, %v14_v3  ;;  %v877_v44 = vld [vmem:[%s1329_s0 + $0x10] sm:$0xff]  ;;  %v881_v62 = vld [vmem:[%s1329_s0 + $0x18] sm:$0xff] }
   0x4   :  { %1031 = vmatpush3.bf16.msra.mxu0 %v1180_v5  ;;  %1037 = vmatpush3.bf16.msra.mxu1 %v1180_v5 }
   0x5   :  { %1032 = vmatprep.subr.bf16.mxu0 %v1147_v0  ;;  %1038 = vmatprep.subr.bf16.mxu1 %v1147_v0 }
   0x8   :  { %1034 = vmatpush3.bf16.msra.mxu0 %v1189_v7  ;;  %1040 = vmatpush3.bf16.msra.mxu1 %v1189_v7 }
   0x9   :  { %1041 = vmatprep.subr.bf16.mxu0 %v1147_v0  ;;  %1047 = vmatprep.subr.bf16.mxu1 %v1147_v0 }
   0xb   :  { %950 = vmatmul.mubr.f32.vlgmr.msra.gmra.mrb[0].mxu0 %v1149_v4 }
   0xc   :  { %1043 = vmatpush3.bf16.msra.mxu0 %v1180_v5  ;;  %971 = vmatprep.mubr.msk.f32.mxu0 %vm1148_vm0, %v1149_v4 }
   0xd   :  { %1044 = vmatprep.subr.bf16.mxu0 %v1147_v0 }
  0x10   :  { %1046 = vmatpush3.bf16.msra.mxu0 %v1189_v7 }
  0x11   :  { %1053 = vmatprep.subr.bf16.mxu0 %v1147_v0 }
  0xde   :  { %v86_v9 = vpop.f32.mrb[0].mxu0 }
  0xdf   :  { %v90_v10 = vadd.f32 %v86_v9, %v11_v8  ;;  %v951_v11 = vpop.f32.mrb[1].mxu0 }
  0xe1   :  { %v872_v12 = vmul.f32 -1.442695, %v90_v10 }
  0xe3   :  { %1083 = vpow2.f32 %v872_v12 }
  0xed   :  { %v1084_v13 = vpop.eup %1083 }
  0xee   :  { %v94_v14 = vadd.f32 1.0, %v1084_v13 }
  0xf0   :  { %1085 = vrcp.f32 %v94_v14 }
  0xf1   :  { %1087 = vtanh.f32 %v90_v10 }
  0xfa   :  { %v1086_v15 = vpop.eup %1085 }
  0xfb   :  { %110 = vrot.lane.b32.xlu1 %v1086_v15, %s1150_s18  ;;  %99 = vrot.lane.b32.xlu0 %v1086_v15, %s1151_s19  ;;  %v103_v16 = vmul.f32 0.0, %v1086_v15  ;;  %v1088_v18 = vpop.eup %1087 }
  0xff   :  { %105 = vrot.lane.b32.xlu0 %v103_v16, %s1152_s20 }
 0x16d   :  { %v100_v17 = vpop.permute.xlu0 %99  ;;  %v111_v23 = vpop.permute.xlu1 %110 }
 0x16e   :  { %v102_v19 = vmul.f32 %v1088_v18, %v100_v17 }
 0x171   :  { %v106_v20 = vpop.permute.xlu0 %105 }
 0x172   :  { %v108_v21 = vadd.f32 %v106_v20, %v102_v19  ;;  %v885_v20 = vld [vmem:[%s1329_s0 + $0x20] sm:$0xff] }
 0x174   :  { %1089 = vtanh.f32 %v108_v21 }
 0x17e   :  { %v1090_v22 = vpop.eup %1089 }
 0x17f   :  { %v113_v24 = vmul.f32 %v1090_v22, %v111_v23 }
 0x181   :  { %115 = vrot.lane.b32.xlu1 %v113_v24, %s1150_s18 }
 0x1f3   :  { %v116_v25 = vpop.permute.xlu1 %115 }
 0x1f4   :  { %118 = vst.msk [vmem:[%s1330_s2] sm:$0xff] %vm16_vm1, %v116_v25  ;;  %961 = vmatmul.mubr.msk.f32.vlgmr.msra.gmra.mrb[0].mxu1 %vm16_vm1, %v116_v25 }
 0x1f5   :  { %1049 = vmatpush3.bf16.msra.mxu1 %v1180_v5  ;;  %982 = vmatprep.mubr.msk.f32.mxu1 %vm1148_vm0, %v1149_v4 }
 0x1f6   :  { %1050 = vmatprep.subr.bf16.mxu1 %v1147_v0 }
 0x1f9   :  { %1052 = vmatpush3.bf16.msra.mxu1 %v1189_v7 }
 0x1fa   :  { %1059 = vmatprep.subr.bf16.mxu1 %v1147_v0 }
 0x2c7   :  { %v193_v27 = vpop.f32.mrb[0].mxu1 }
 0x2c8   :  { %v197_v28 = vadd.f32 %v873_v26, %v193_v27  ;;  %v962_v29 = vpop.f32.mrb[1].mxu1 }
 0x2ca   :  { %v875_v30 = vmul.f32 -1.442695, %v197_v28 }
 0x2cc   :  { %1091 = vpow2.f32 %v875_v30 }
 0x2d6   :  { %v1092_v31 = vpop.eup %1091 }
 0x2d7   :  { %v201_v32 = vadd.f32 1.0, %v1092_v31 }
 0x2d9   :  { %1093 = vrcp.f32 %v201_v32 }
 0x2da   :  { %1095 = vtanh.f32 %v197_v28 }
 0x2e3   :  { %v1094_v33 = vpop.eup %1093 }
 0x2e4   :  { %210 = vrot.lane.b32.xlu1 %v1094_v33, %s1152_s20  ;;  %206 = vrot.lane.b32.xlu0 %v1094_v33, %s1151_s19  ;;  %v1096_v34 = vpop.eup %1095 }
 0x2e8   :  { %216 = vrot.lane.b32.xlu0 %v1094_v33, %s1150_s18 }
 0x356   :  { %v211_v35 = vpop.permute.xlu1 %210  ;;  %v207_v36 = vpop.permute.xlu0 %206 }
 0x357   :  { %v213_v37 = vmul.f32 %v211_v35, %v108_v21  ;;  %v209_v38 = vmul.f32 %v1096_v34, %v207_v36 }
 0x359   :  { %v214_v39 = vadd.f32 %v213_v37, %v209_v38  ;;  %v889_v38 = vld [vmem:[%s1329_s0 + $0x28] sm:$0xff] }
 0x35a   :  { %v217_v41 = vpop.permute.xlu0 %216 }
 0x35b   :  { %1097 = vtanh.f32 %v214_v39 }
 0x365   :  { %v1098_v40 = vpop.eup %1097 }
 0x366   :  { %v219_v42 = vmul.f32 %v1098_v40, %v217_v41 }
 0x368   :  { %221 = vrot.lane.b32.xlu1 %v219_v42, %s1150_s18 }
 0x3da   :  { %v222_v43 = vpop.permute.xlu1 %221 }
 0x3db   :  { %876 = vst.msk [vmem:[%s1330_s2 + $0x8] sm:$0xff] %vm16_vm1, %v222_v43  ;;  %972 = vmatmul.mubr.msk.f32.vlgmr.msra.gmra.mrb[2].mxu0 %vm16_vm1, %v222_v43 }
 0x3dc   :  { %1055 = vmatpush3.bf16.msra.mxu0 %v1180_v5  ;;  %993 = vmatprep.mubr.msk.f32.mxu0 %vm1148_vm0, %v1149_v4 }
 0x3dd   :  { %1056 = vmatprep.subr.bf16.mxu0 %v1147_v0 }
 0x3e0   :  { %1058 = vmatpush3.bf16.msra.mxu0 %v1189_v7 }
 0x3e1   :  { %1065 = vmatprep.subr.bf16.mxu0 %v1147_v0 }
 0x4ae   :  { %v300_v45 = vpop.f32.mrb[2].mxu0 }
 0x4af   :  { %v304_v46 = vadd.f32 %v877_v44, %v300_v45  ;;  %v973_v47 = vpop.f32.mrb[3].mxu0 }
 0x4b1   :  { %v879_v48 = vmul.f32 -1.442695, %v304_v46 }
 0x4b3   :  { %1099 = vpow2.f32 %v879_v48 }
 0x4bd   :  { %v1100_v49 = vpop.eup %1099 }
 0x4be   :  { %v308_v50 = vadd.f32 1.0, %v1100_v49 }
 0x4c0   :  { %1101 = vrcp.f32 %v308_v50 }
 0x4c1   :  { %1103 = vtanh.f32 %v304_v46 }
 0x4ca   :  { %v1102_v51 = vpop.eup %1101 }
 0x4cb   :  { %317 = vrot.lane.b32.xlu1 %v1102_v51, %s1152_s20  ;;  %313 = vrot.lane.b32.xlu0 %v1102_v51, %s1151_s19  ;;  %v1104_v52 = vpop.eup %1103 }
 0x4cf   :  { %323 = vrot.lane.b32.xlu0 %v1102_v51, %s1150_s18 }
 0x53d   :  { %v318_v53 = vpop.permute.xlu1 %317  ;;  %v314_v54 = vpop.permute.xlu0 %313 }
 0x53e   :  { %v320_v55 = vmul.f32 %v318_v53, %v214_v39  ;;  %v316_v56 = vmul.f32 %v1104_v52, %v314_v54  ;;  %v893_v52 = vld [vmem:[%s1329_s0 + $0x30] sm:$0xff] }
 0x540   :  { %v321_v57 = vadd.f32 %v320_v55, %v316_v56 }
 0x541   :  { %v324_v59 = vpop.permute.xlu0 %323 }
 0x542   :  { %1105 = vtanh.f32 %v321_v57 }
 0x54c   :  { %v1106_v58 = vpop.eup %1105 }
 0x54d   :  { %v326_v60 = vmul.f32 %v1106_v58, %v324_v59 }
 0x54f   :  { %328 = vrot.lane.b32.xlu1 %v326_v60, %s1150_s18 }
 0x5c1   :  { %v329_v61 = vpop.permute.xlu1 %328 }
 0x5c2   :  { %880 = vst.msk [vmem:[%s1330_s2 + $0x10] sm:$0xff] %vm16_vm1, %v329_v61  ;;  %983 = vmatmul.mubr.msk.f32.vlgmr.msra.gmra.mrb[2].mxu1 %vm16_vm1, %v329_v61 }
 0x5c3   :  { %1061 = vmatpush3.bf16.msra.mxu1 %v1180_v5  ;;  %1004 = vmatprep.mubr.msk.f32.mxu1 %vm1148_vm0, %v1149_v4 }
 0x5c4   :  { %1062 = vmatprep.subr.bf16.mxu1 %v1147_v0 }
 0x5c7   :  { %1064 = vmatpush3.bf16.msra.mxu1 %v1189_v7 }
 0x5c8   :  { %1071 = vmatprep.subr.bf16.mxu1 %v1147_v0 }
 0x695   :  { %v407_v63 = vpop.f32.mrb[2].mxu1 }
 0x696   :  { %v411_v1 = vadd.f32 %v881_v62, %v407_v63  ;;  %v984_v2 = vpop.f32.mrb[3].mxu1 }
 0x698   :  { %v883_v3 = vmul.f32 -1.442695, %v411_v1 }
 0x69a   :  { %1107 = vpow2.f32 %v883_v3 }
 0x6a4   :  { %v1108_v6 = vpop.eup %1107 }
 0x6a5   :  { %v415_v8 = vadd.f32 1.0, %v1108_v6 }
 0x6a7   :  { %1109 = vrcp.f32 %v415_v8 }
 0x6a8   :  { %1111 = vtanh.f32 %v411_v1 }
 0x6b1   :  { %v1110_v9 = vpop.eup %1109 }
 0x6b2   :  { %424 = vrot.lane.b32.xlu1 %v1110_v9, %s1152_s20  ;;  %420 = vrot.lane.b32.xlu0 %v1110_v9, %s1151_s19  ;;  %v1112_v10 = vpop.eup %1111 }
 0x6b6   :  { %430 = vrot.lane.b32.xlu0 %v1110_v9, %s1150_s18 }
 0x724   :  { %v425_v11 = vpop.permute.xlu1 %424  ;;  %v421_v12 = vpop.permute.xlu0 %420 }
 0x725   :  { %v427_v13 = vmul.f32 %v425_v11, %v321_v57  ;;  %v423_v14 = vmul.f32 %v1112_v10, %v421_v12  ;;  %v897_v10 = vld [vmem:[%s1329_s0 + $0x38] sm:$0xff] }
 0x727   :  { %v428_v15 = vadd.f32 %v427_v13, %v423_v14 }
 0x728   :  { %v431_v17 = vpop.permute.xlu0 %430 }
 0x729   :  { %1113 = vtanh.f32 %v428_v15 }
 0x733   :  { %v1114_v16 = vpop.eup %1113 }
 0x734   :  { %v433_v18 = vmul.f32 %v1114_v16, %v431_v17 }
 0x736   :  { %435 = vrot.lane.b32.xlu1 %v433_v18, %s1150_s18 }
 0x7a8   :  { %v436_v19 = vpop.permute.xlu1 %435 }
 0x7a9   :  { %884 = vst.msk [vmem:[%s1330_s2 + $0x18] sm:$0xff] %vm16_vm1, %v436_v19  ;;  %994 = vmatmul.mubr.msk.f32.vlgmr.msra.gmra.mrb[4].mxu0 %vm16_vm1, %v436_v19 }
 0x7aa   :  { %1067 = vmatpush3.bf16.msra.mxu0 %v1180_v5  ;;  %1015 = vmatprep.mubr.msk.f32.mxu0 %vm1148_vm0, %v1149_v4 }
 0x7ab   :  { %1068 = vmatprep.subr.bf16.mxu0 %v1147_v0 }
 0x7ae   :  { %1070 = vmatpush3.bf16.msra.mxu0 %v1189_v7 }
 0x87c   :  { %v514_v21 = vpop.f32.mrb[4].mxu0 }
 0x87d   :  { %v518_v22 = vadd.f32 %v885_v20, %v514_v21  ;;  %v995_v23 = vpop.f32.mrb[5].mxu0 }
 0x87f   :  { %v887_v24 = vmul.f32 -1.442695, %v518_v22 }
 0x881   :  { %1115 = vpow2.f32 %v887_v24 }
 0x88b   :  { %v1116_v25 = vpop.eup %1115 }
 0x88c   :  { %v522_v26 = vadd.f32 1.0, %v1116_v25 }
 0x88e   :  { %1117 = vrcp.f32 %v522_v26 }
 0x88f   :  { %1119 = vtanh.f32 %v518_v22 }
 0x898   :  { %v1118_v27 = vpop.eup %1117 }
 0x899   :  { %531 = vrot.lane.b32.xlu1 %v1118_v27, %s1152_s20  ;;  %527 = vrot.lane.b32.xlu0 %v1118_v27, %s1151_s19  ;;  %v1120_v28 = vpop.eup %1119 }
 0x89d   :  { %537 = vrot.lane.b32.xlu0 %v1118_v27, %s1150_s18 }
 0x90b   :  { %v532_v29 = vpop.permute.xlu1 %531  ;;  %v528_v30 = vpop.permute.xlu0 %527 }
 0x90c   :  { %v534_v31 = vmul.f32 %v532_v29, %v428_v15  ;;  %v530_v32 = vmul.f32 %v1120_v28, %v528_v30 }
 0x90e   :  { %v535_v33 = vadd.f32 %v534_v31, %v530_v32 }
 0x90f   :  { %v538_v35 = vpop.permute.xlu0 %537 }
 0x910   :  { %1121 = vtanh.f32 %v535_v33 }
 0x91a   :  { %v1122_v34 = vpop.eup %1121 }
 0x91b   :  { %v540_v36 = vmul.f32 %v1122_v34, %v538_v35 }
 0x91d   :  { %542 = vrot.lane.b32.xlu1 %v540_v36, %s1150_s18 }
 0x98f   :  { %v543_v37 = vpop.permute.xlu1 %542 }
 0x990   :  { %888 = vst.msk [vmem:[%s1330_s2 + $0x20] sm:$0xff] %vm16_vm1, %v543_v37  ;;  %1005 = vmatmul.mubr.msk.f32.vlgmr.msra.gmra.mrb[4].mxu1 %vm16_vm1, %v543_v37 }
 0x991   :  { %1073 = vmatpush3.bf16.msra.mxu1 %v1180_v5  ;;  %1026 = vmatprep.mubr.msk.f32.mxu1 %vm1148_vm0, %v1149_v4 }
 0x992   :  { %1074 = vmatprep.subr.bf16.mxu1 %v1147_v0 }
 0x995   :  { %1076 = vmatpush3.bf16.msra.mxu1 %v1189_v7 }
 0xa63   :  { %v621_v39 = vpop.f32.mrb[4].mxu1 }
 0xa64   :  { %v625_v40 = vadd.f32 %v889_v38, %v621_v39  ;;  %v1006_v41 = vpop.f32.mrb[5].mxu1 }
 0xa66   :  { %v891_v42 = vmul.f32 -1.442695, %v625_v40 }
 0xa68   :  { %1123 = vpow2.f32 %v891_v42 }
 0xa72   :  { %v1124_v43 = vpop.eup %1123 }
 0xa73   :  { %v629_v44 = vadd.f32 1.0, %v1124_v43 }
 0xa75   :  { %1125 = vrcp.f32 %v629_v44 }
 0xa76   :  { %1127 = vtanh.f32 %v625_v40 }
 0xa7f   :  { %v1126_v5 = vpop.eup %1125 }
 0xa80   :  { %638 = vrot.lane.b32.xlu1 %v1126_v5, %s1152_s20  ;;  %634 = vrot.lane.b32.xlu0 %v1126_v5, %s1151_s19  ;;  %v1128_v0 = vpop.eup %1127 }
 0xa84   :  { %644 = vrot.lane.b32.xlu0 %v1126_v5, %s1150_s18 }
 0xaf2   :  { %v639_v4 = vpop.permute.xlu1 %638  ;;  %v635_v7 = vpop.permute.xlu0 %634 }
 0xaf3   :  { %v641_v45 = vmul.f32 %v639_v4, %v535_v33  ;;  %v637_v46 = vmul.f32 %v1128_v0, %v635_v7 }
 0xaf5   :  { %v642_v47 = vadd.f32 %v641_v45, %v637_v46 }
 0xaf6   :  { %v645_v49 = vpop.permute.xlu0 %644 }
 0xaf7   :  { %1129 = vtanh.f32 %v642_v47 }
 0xb01   :  { %v1130_v48 = vpop.eup %1129 }
 0xb02   :  { %v647_v50 = vmul.f32 %v1130_v48, %v645_v49 }
 0xb04   :  { %649 = vrot.lane.b32.xlu1 %v647_v50, %s1150_s18 }
 0xb76   :  { %v650_v51 = vpop.permute.xlu1 %649 }
 0xb77   :  { %892 = vst.msk [vmem:[%s1330_s2 + $0x28] sm:$0xff] %vm16_vm1, %v650_v51  ;;  %1016 = vmatmul.mubr.msk.f32.vlgmr.msra.gmra.mrb[6].mxu0 %vm16_vm1, %v650_v51 }
 0xc4a   :  { %v728_v53 = vpop.f32.mrb[6].mxu0 }
 0xc4b   :  { %v732_v54 = vadd.f32 %v893_v52, %v728_v53  ;;  %v1017_v55 = vpop.f32.mrb[7].mxu0 }
 0xc4d   :  { %v895_v56 = vmul.f32 -1.442695, %v732_v54 }
 0xc4f   :  { %1131 = vpow2.f32 %v895_v56 }
 0xc59   :  { %v1132_v57 = vpop.eup %1131 }
 0xc5a   :  { %v736_v58 = vadd.f32 1.0, %v1132_v57 }
 0xc5c   :  { %1133 = vrcp.f32 %v736_v58 }
 0xc5d   :  { %1135 = vtanh.f32 %v732_v54 }
 0xc66   :  { %v1134_v59 = vpop.eup %1133 }
 0xc67   :  { %745 = vrot.lane.b32.xlu1 %v1134_v59, %s1152_s20  ;;  %741 = vrot.lane.b32.xlu0 %v1134_v59, %s1151_s19  ;;  %v1136_v60 = vpop.eup %1135 }
 0xc6b   :  { %751 = vrot.lane.b32.xlu0 %v1134_v59, %s1150_s18 }
 0xcd9   :  { %v746_v61 = vpop.permute.xlu1 %745  ;;  %v742_v62 = vpop.permute.xlu0 %741 }
 0xcda   :  { %v748_v63 = vmul.f32 %v746_v61, %v642_v47  ;;  %v744_v1 = vmul.f32 %v1136_v60, %v742_v62 }
 0xcdc   :  { %v749_v2 = vadd.f32 %v748_v63, %v744_v1 }
 0xcdd   :  { %v752_v6 = vpop.permute.xlu0 %751 }
 0xcde   :  { %1137 = vtanh.f32 %v749_v2 }
 0xce8   :  { %v1138_v3 = vpop.eup %1137 }
 0xce9   :  { %v754_v8 = vmul.f32 %v1138_v3, %v752_v6 }
 0xceb   :  { %756 = vrot.lane.b32.xlu1 %v754_v8, %s1150_s18 }
 0xd5d   :  { %v757_v9 = vpop.permute.xlu1 %756 }
 0xd5e   :  { %896 = vst.msk [vmem:[%s1330_s2 + $0x30] sm:$0xff] %vm16_vm1, %v757_v9  ;;  %1027 = vmatmul.mubr.msk.f32.vlgmr.msra.gmra.mrb[6].mxu1 %vm16_vm1, %v757_v9 }
 0xe31   :  { %v835_v11 = vpop.f32.mrb[6].mxu1 }
 0xe32   :  { %v839_v12 = vadd.f32 %v897_v10, %v835_v11  ;;  %v1028_v13 = vpop.f32.mrb[7].mxu1 }
 0xe34   :  { %v899_v14 = vmul.f32 -1.442695, %v839_v12 }
 0xe36   :  { %1139 = vpow2.f32 %v899_v14 }
 0xe40   :  { %v1140_v15 = vpop.eup %1139 }
 0xe41   :  { %v843_v16 = vadd.f32 1.0, %v1140_v15 }
 0xe43   :  { %1141 = vrcp.f32 %v843_v16 }
 0xe44   :  { %1143 = vtanh.f32 %v839_v12 }
 0xe4d   :  { %v1142_v17 = vpop.eup %1141 }
 0xe4e   :  { %852 = vrot.lane.b32.xlu1 %v1142_v17, %s1152_s20  ;;  %848 = vrot.lane.b32.xlu0 %v1142_v17, %s1151_s19  ;;  %v1144_v18 = vpop.eup %1143 }
 0xe52   :  { %858 = vrot.lane.b32.xlu0 %v1142_v17, %s1150_s18 }
 0xec0   :  { %v853_v19 = vpop.permute.xlu1 %852  ;;  %v849_v20 = vpop.permute.xlu0 %848 }
 0xec1   :  { %v855_v21 = vmul.f32 %v853_v19, %v749_v2  ;;  %v851_v22 = vmul.f32 %v1144_v18, %v849_v20 }
 0xec3   :  { %v856_v23 = vadd.f32 %v855_v21, %v851_v22 }
 0xec4   :  { %v859_v25 = vpop.permute.xlu0 %858 }
 0xec5   :  { %1145 = vtanh.f32 %v856_v23 }
 0xecf   :  { %v1146_v24 = vpop.eup %1145 }
 0xed0   :  { %v861_v26 = vmul.f32 %v1146_v24, %v859_v25 }
 0xed2   :  { %863 = vrot.lane.b32.xlu1 %v861_v26, %s1150_s18 }
 0xf44   :  { %v864_v27 = vpop.permute.xlu1 %863 }
 0xf45   :  { %900 = vst.msk [vmem:[%s1330_s2 + $0x38] sm:$0xff] %vm16_vm1, %v864_v27 }

</bundles_post_ra>
